<compile_context>
chip_gen: v6e
topology: v6e:2x2x1
jax: 0.10.0
libtpu: 0.0.40
codegen_flags: <defaults>
</compile_context>

<pallas_src>
import functools

import jax
import jax.numpy as jnp
from jax import lax
from jax.experimental import pallas as pl
from jax.experimental.pallas import tpu as pltpu

IN_FEATURES = 20
HIDDEN0 = 10          # num_units
HIDDEN1 = 10
OUT_CLASSES = 2

# Packed transposed-weight buffer (bf16), shape (22, 20):
#   rows [ 0:10), cols [0:20) = dense0.weight^T rows  (10, 20)
#   rows [10:20), cols [0:10) = dense1.weight^T rows  (10, 10)
#   rows [20:22), cols [0:10) = output.weight^T rows  ( 2, 10)
W_ROWS = HIDDEN0 + HIDDEN1 + OUT_CLASSES   # 22
W_COLS = IN_FEATURES                       # 20
# Packed bias buffer (f32), shape (22, 1): [b0; b1; b2] as a single column.


def mlp_kernel(x_ref, w_ref, b_ref, o_ref):
    # x tile arrives f32 straight from HBM; bf16 cast is fused here (no extra
    # wrapper-side HBM pass).
    x = x_ref[...].astype(jnp.bfloat16)                      # (tb, 20)
    w = w_ref[...]                                           # (22, 20) bf16, resident
    b = b_ref[...]                                           # (22, 1)  f32, resident

    w0t = w[0:HIDDEN0, :]                                    # (10, 20)
    w1t = w[HIDDEN0:HIDDEN0 + HIDDEN1, 0:HIDDEN0]            # (10, 10)
    w2t = w[HIDDEN0 + HIDDEN1:, 0:HIDDEN1]                   # ( 2, 10)

    # dense0 + ReLU: contract x's feature dim -> (10, tb); batch on lanes.
    h0 = lax.dot_general(w0t, x, (((1,), (1,)), ((), ())),
                         preferred_element_type=jnp.float32)
    h0 = jnp.maximum(h0 + b[0:HIDDEN0, :], 0.0)

    # TODO(synk): nn.Dropout(0.5) is identity in eval mode; training-mode
    # dropout (pltpu.prng_seed / prng_random_bits + 1/(1-p)=2.0 scale) not
    # implemented here.

    # dense1 + ReLU: (10, 10) @ (10, tb) -> (10, tb)
    h1 = lax.dot_general(w1t, h0.astype(jnp.bfloat16),
                         (((1,), (0,)), ((), ())),
                         preferred_element_type=jnp.float32)
    h1 = jnp.maximum(h1 + b[HIDDEN0:HIDDEN0 + HIDDEN1, :], 0.0)

    # output layer: (2, 10) @ (10, tb) -> (2, tb).  2-class softmax is exactly
    # sigmoid(logit0 - logit1); this rewrite is ONLY valid for OUT_CLASSES==2.
    logits = lax.dot_general(w2t, h1.astype(jnp.bfloat16),
                             (((1,), (0,)), ((), ())),
                             preferred_element_type=jnp.float32)
    logits = logits + b[HIDDEN0 + HIDDEN1:, :]
    p0 = jax.nn.sigmoid(logits[0:1, :] - logits[1:2, :])     # (1, tb)

    # Two direct full-lane-width row stores (no lane-axis concatenate).
    o_ref[0:1, :] = p0
    o_ref[1:2, :] = 1.0 - p0


def _round_up(n, m):
    return ((n + m - 1) // m) * m


def pack_params(w0, b0, w1, b1, w2, b2):
    """Pack the 6 Linear params (stored (in, out)) into two buffers:
    a (22, 20) bf16 transposed-weight buffer and a (22, 1) f32 bias column."""
    w = jnp.zeros((W_ROWS, W_COLS), jnp.float32)
    w = w.at[0:HIDDEN0, 0:IN_FEATURES].set(w0.T)
    w = w.at[HIDDEN0:HIDDEN0 + HIDDEN1, 0:HIDDEN0].set(w1.T)
    w = w.at[HIDDEN0 + HIDDEN1:, 0:HIDDEN1].set(w2.T)
    w_packed = w.astype(jnp.bfloat16)
    b_packed = jnp.concatenate(
        [b0.reshape(-1), b1.reshape(-1), b2.reshape(-1)]
    ).reshape(W_ROWS, 1).astype(jnp.float32)
    return w_packed, b_packed


def my_module_forward(x, w_packed, b_packed, block_b=4096):
    """x: (B, 20) float -> (B, 2) float32 softmax probabilities.

    Batch-tiled, pipelined Pallas kernel with a batch-on-lanes compute layout.
    Weights / biases stay VMEM-resident across all grid steps (constant
    index_maps).  The partial last batch tile is handled by Pallas' masked
    boundary writes (no wrapper-side pad / slice copies).

    Note: for very small B a plain jitted jnp expression beats any kernel
    (launch + pipeline prologue dominate); this wrapper always dispatches to
    Pallas for demonstration.
    """
    B = x.shape[0]
    x = x.astype(jnp.float32)   # no-op for f32 inputs; bf16 cast happens in-kernel

    # Rows per grid step: a multiple of 128 (lane-dense output stores), or the
    # full batch when B fits in a single block (full-extent block is allowed).
    tb = min(_round_up(block_b, 128), _round_up(B, 128))
    if tb >= B:
        tb = B
    grid = (pl.cdiv(B, tb),)

    out_t = pl.pallas_call(
        mlp_kernel,
        out_shape=jax.ShapeDtypeStruct((OUT_CLASSES, B), jnp.float32),
        grid=grid,
        in_specs=[
            pl.BlockSpec((tb, IN_FEATURES), lambda i: (i, 0)),   # batch-tiled x
            pl.BlockSpec((W_ROWS, W_COLS), lambda i: (0, 0)),    # resident weights
            pl.BlockSpec((W_ROWS, 1), lambda i: (0, 0)),         # resident biases
        ],
        out_specs=pl.BlockSpec((OUT_CLASSES, tb), lambda i: (0, i)),  # lane-dense
        compiler_params=pltpu.CompilerParams(
            dimension_semantics=("parallel",),   # lets v7x shard batch over 2 TCs
        ),
    )(x, w_packed, b_packed)
    # Tiny (2, B) -> (B, 2) transpose to match the torch module's output layout.
    return out_t.T


def init_params(key, num_units=10):
    """Deterministic init mirroring nn.Linear shapes (stored as (in, out))."""
    ks = jax.random.split(key, 6)

    def lin(kw, kb, fan_in, fan_out):
        bound = 1.0 / jnp.sqrt(fan_in)
        w = jax.random.uniform(kw, (fan_in, fan_out), jnp.float32, -bound, bound)
        b = jax.random.uniform(kb, (1, fan_out), jnp.float32, -bound, bound)
        return w, b

    w0, b0 = lin(ks[0], ks[1], IN_FEATURES, num_units)
    w1, b1 = lin(ks[2], ks[3], num_units, HIDDEN1)
    w2, b2 = lin(ks[4], ks[5], HIDDEN1, OUT_CLASSES)
    return (w0, b0, w1, b1, w2, b2)


if __name__ == "__main__":
    key = jax.random.PRNGKey(0)
    k_x, k_p = jax.random.split(key)

    # Small demo batch; non-multiple of the tile -> exercises grid=(2,) with a
    # partial (masked) boundary block.
    B = 200
    x = jax.random.normal(k_x, (B, IN_FEATURES), dtype=jnp.float32)
    w0, b0, w1, b1, w2, b2 = init_params(k_p, num_units=HIDDEN0)
    w_packed, b_packed = pack_params(w0, b0, w1, b1, w2, b2)

    fwd = jax.jit(functools.partial(my_module_forward, block_b=128))
    out = jax.block_until_ready(fwd(x, w_packed, b_packed))

    # Pure-JAX f32 reference (tolerance covers bf16 MXU operands).
    def ref_forward(xx):
        h0 = jnp.maximum(xx @ w0 + b0, 0.0)
        h1 = jnp.maximum(h0 @ w1 + b1, 0.0)
        return jax.nn.softmax(h1 @ w2 + b2, axis=-1)

    ref = ref_forward(x)

    assert out.shape == (B, OUT_CLASSES)
    assert bool(jnp.all(jnp.isfinite(out)))
    assert bool(jnp.allclose(jnp.sum(out, axis=-1), 1.0, atol=1e-5))
    assert bool(jnp.allclose(out, ref, atol=2e-2))

    print("KERNEL_OK")
</pallas_src>

<mosaic_0001>
module attributes {stable_mosaic.version = 11 : i64} {
  func.func @mlp_kernel(%arg0: i32, %arg1: memref<128x20xf32, #tpu.memory_space<vmem>>, %arg2: memref<22x20xbf16, #tpu.memory_space<vmem>>, %arg3: memref<22x1xf32, #tpu.memory_space<vmem>>, %arg4: memref<2x128xf32, #tpu.memory_space<vmem>>) attributes {dimension_semantics = [#tpu.dimension_semantics<parallel>], iteration_bounds = array<i64: 2>, scalar_prefetch = 0 : i64, scratch_operands = 0 : i64, tpu.core_type = #tpu.core_type<tc>, window_params = [{transform_indices = @transform_0, window_bounds = array<i64: 128, 20>}, {pipeline_mode = #tpu.pipeline_mode<synchronous>, transform_indices = @transform_1, window_bounds = array<i64: 22, 20>}, {pipeline_mode = #tpu.pipeline_mode<synchronous>, transform_indices = @transform_2, window_bounds = array<i64: 22, 1>}, {transform_indices = @transform_3, window_bounds = array<i64: 2, 128>}]} {
    %c0 = arith.constant 0 : index
    %c0_0 = arith.constant 0 : index
    %0 = vector.load %arg1[%c0, %c0_0] : memref<128x20xf32, #tpu.memory_space<vmem>>, vector<128x20xf32>
    %1 = arith.truncf %0 : vector<128x20xf32> to vector<128x20xbf16>
    %c0_1 = arith.constant 0 : index
    %c0_2 = arith.constant 0 : index
    %2 = vector.load %arg2[%c0_1, %c0_2] : memref<22x20xbf16, #tpu.memory_space<vmem>>, vector<22x20xbf16>
    %c0_3 = arith.constant 0 : index
    %c0_4 = arith.constant 0 : index
    %3 = vector.load %arg3[%c0_3, %c0_4] : memref<22x1xf32, #tpu.memory_space<vmem>>, vector<22x1xf32>
    %4 = vector.extract_strided_slice %2 {offsets = [0, 0], sizes = [10, 20], strides = [1, 1]} : vector<22x20xbf16> to vector<10x20xbf16>
    %5 = vector.extract_strided_slice %2 {offsets = [10, 0], sizes = [10, 10], strides = [1, 1]} : vector<22x20xbf16> to vector<10x10xbf16>
    %6 = vector.extract_strided_slice %2 {offsets = [20, 0], sizes = [2, 10], strides = [1, 1]} : vector<22x20xbf16> to vector<2x10xbf16>
    %cst = arith.constant dense<0.000000e+00> : vector<10x128xf32>
    %7 = tpu.matmul %4, %1, %cst {dimension_numbers = #tpu.dot_dimension_numbers<[1], [1], [0], [0], [0, 0, 1, 0], [], []>} : vector<10x20xbf16>, vector<128x20xbf16>, vector<10x128xf32> -> vector<10x128xf32>
    %8 = vector.extract_strided_slice %3 {offsets = [0, 0], sizes = [10, 1], strides = [1, 1]} : vector<22x1xf32> to vector<10x1xf32>
    %9 = vector.broadcast %8 : vector<10x1xf32> to vector<10x128xf32>
    %10 = arith.addf %7, %9 : vector<10x128xf32>
    %cst_5 = arith.constant 0.000000e+00 : f32
    %11 = vector.broadcast %cst_5 : f32 to vector<10x128xf32>
    %12 = arith.maximumf %10, %11 : vector<10x128xf32>
    %13 = arith.truncf %12 : vector<10x128xf32> to vector<10x128xbf16>
    %cst_6 = arith.constant dense<0.000000e+00> : vector<10x128xf32>
    %14 = tpu.matmul %5, %13, %cst_6 {dimension_numbers = #tpu.dot_dimension_numbers<[1], [0], [0], [1], [0, 0, 1, 1], [], []>} : vector<10x10xbf16>, vector<10x128xbf16>, vector<10x128xf32> -> vector<10x128xf32>
    %15 = vector.extract_strided_slice %3 {offsets = [10, 0], sizes = [10, 1], strides = [1, 1]} : vector<22x1xf32> to vector<10x1xf32>
    %16 = vector.broadcast %15 : vector<10x1xf32> to vector<10x128xf32>
    %17 = arith.addf %14, %16 : vector<10x128xf32>
    %cst_7 = arith.constant 0.000000e+00 : f32
    %18 = vector.broadcast %cst_7 : f32 to vector<10x128xf32>
    %19 = arith.maximumf %17, %18 : vector<10x128xf32>
    %20 = arith.truncf %19 : vector<10x128xf32> to vector<10x128xbf16>
    %cst_8 = arith.constant dense<0.000000e+00> : vector<2x128xf32>
    %21 = tpu.matmul %6, %20, %cst_8 {dimension_numbers = #tpu.dot_dimension_numbers<[1], [0], [0], [1], [0, 0, 1, 1], [], []>} : vector<2x10xbf16>, vector<10x128xbf16>, vector<2x128xf32> -> vector<2x128xf32>
    %22 = vector.extract_strided_slice %3 {offsets = [20, 0], sizes = [2, 1], strides = [1, 1]} : vector<22x1xf32> to vector<2x1xf32>
    %23 = vector.broadcast %22 : vector<2x1xf32> to vector<2x128xf32>
    %24 = arith.addf %21, %23 : vector<2x128xf32>
    %25 = vector.extract_strided_slice %24 {offsets = [0, 0], sizes = [1, 128], strides = [1, 1]} : vector<2x128xf32> to vector<1x128xf32>
    %26 = vector.extract_strided_slice %24 {offsets = [1, 0], sizes = [1, 128], strides = [1, 1]} : vector<2x128xf32> to vector<1x128xf32>
    %27 = arith.subf %25, %26 : vector<1x128xf32>
    %28 = arith.negf %27 : vector<1x128xf32>
    %29 = math.exp %28 : vector<1x128xf32>
    %cst_9 = arith.constant 1.000000e+00 : f32
    %30 = vector.broadcast %cst_9 : f32 to vector<1x128xf32>
    %31 = arith.addf %30, %29 : vector<1x128xf32>
    %32 = arith.divf %30, %31 : vector<1x128xf32>
    %c0_10 = arith.constant 0 : index
    %c0_11 = arith.constant 0 : index
    %33 = vector.load %arg4[%c0_10, %c0_11] : memref<2x128xf32, #tpu.memory_space<vmem>>, vector<1x128xf32>
    tpu.vector_store %arg4[%c0_10, %c0_11], %32 {strides = array<i32>} : memref<2x128xf32, #tpu.memory_space<vmem>>, vector<1x128xf32>,
    %cst_12 = arith.constant 1.000000e+00 : f32
    %34 = vector.broadcast %cst_12 : f32 to vector<1x128xf32>
    %35 = arith.subf %34, %32 : vector<1x128xf32>
    %c1 = arith.constant 1 : index
    %c0_13 = arith.constant 0 : index
    %36 = vector.load %arg4[%c1, %c0_13] : memref<2x128xf32, #tpu.memory_space<vmem>>, vector<1x128xf32>
    tpu.vector_store %arg4[%c1, %c0_13], %35 {strides = array<i32>} : memref<2x128xf32, #tpu.memory_space<vmem>>, vector<1x128xf32>,
    return
  }
  func.func @transform_0(%arg0: i32) -> (i32, i32) {
    %c0_i32 = arith.constant 0 : i32
    %c0_i32_0 = arith.constant 0 : i32
    return %arg0, %c0_i32 : i32, i32
  }
  func.func @transform_1(%arg0: i32) -> (i32, i32) {
    %c0_i32 = arith.constant 0 : i32
    %c0_i32_0 = arith.constant 0 : i32
    %c0_i32_1 = arith.constant 0 : i32
    return %c0_i32, %c0_i32_0 : i32, i32
  }
  func.func @transform_2(%arg0: i32) -> (i32, i32) {
    %c0_i32 = arith.constant 0 : i32
    %c0_i32_0 = arith.constant 0 : i32
    %c0_i32_1 = arith.constant 0 : i32
    return %c0_i32, %c0_i32_0 : i32, i32
  }
  func.func @transform_3(%arg0: i32) -> (i32, i32) {
    %c0_i32 = arith.constant 0 : i32
    %c0_i32_0 = arith.constant 0 : i32
    return %c0_i32, %arg0 : i32, i32
  }
}

</mosaic_0001>

<bundles_post_ra>
// kernel: my_module_forward.1
= control target key start
LH: loop header
LB: loop body
LE: loop exit
PB: predicated region body
PF: predicated region fallthrough
CT: control target
= control target key end

     0   :  { %8 = vsyncpa [#allocation3], 0  ;;  %s862_s0 = inlined_call_operand.vmem [shape: f32[200,20], index: 0, kind: input, shape index: {}]   ;;  %s863_s1 = inlined_call_operand.vmem [shape: bf16[22,20], index: 1, kind: input, shape index: {}]   ;;  %s864_s2 = inlined_call_operand.vmem [shape: f32[22,1], index: 2, kind: input, shape index: {}]   ;;  %s865_s3 = inlined_call_operand.hbm [shape: f32[2,200], index: 3, kind: output, shape index: {}]  }
   0x1   :  { %10 = vsyncpa [#allocation3 + $0x1], 0  ;;  %s711_s12 = smov 0   ;;  %s713_s13 = smov 0  }
   0x2   :  { %s715_s14 = smov 0   ;;  %s717_s15 = smov 0  }
   0x3 LB: > { %s732_s16 = sadd.s32 4294967295, %s685_s15   ;;  %s511_s17 = sadd.s32 4294967294, %s685_s15   ;;  %s685_s15 = sphi %s717_s15, %s871_s15   ;;  %s681_s14 = sphi %s715_s14, %s870_s14   ;;  %s677_s13 = sphi %s713_s13, %s869_s13   ;;  %s673_s12 = sphi %s711_s12, %s868_s12  }
   0x4   : > { %s736_s18 = sadd.s32 1, %s685_s15   ;;  %s91_s19 = sadd.s32 1, %s681_s14 }
   0x5   : > { %s88_s20 = ssub.s32 %s685_s15, %s736_s18  ;;  %p101_p0 = scmp.ne.s32.totalorder %s681_s14, %s677_s13 }
   0x6   : > { %p89_p1 = scmp.eq.s32.totalorder %s88_s20, 0  ;;  %p102_p2 = scmp.eq.s32.totalorder %s732_s16, 1 }
   0x7   : > { %p107_p3 = scmp.ne.s32.totalorder %s677_s13, %s673_s12  ;;  %p108_p4 = scmp.eq.s32.totalorder %s511_s17, 1 }
   0x8   : > { %s747_s21 = scalar_select %p89_p1, %s681_s14, %s91_s19  }
   0x9   : > { %p749_p5 = por %p102_p2, %p101_p0  ;;  %p753_p6 = por %p108_p4, %p107_p3 }
   0xa   : > { %p514_p7 = scmp.ge.s32.totalorder %s685_s15, 1  ;;  %p149_p8 = scmp.lt.s32.totalorder %s685_s15, 3 }
   0xc   : > { %p150_p9 = pnand %p514_p7, %p149_p8 }
   0xd   : > { %s516_s24 = sshll.u32 (!%p150_p9), %s732_s16, 4  ;;  %s174_s20 = sand.u32 (!%p150_p9), 1, %s677_s13  }
   0xe   : > { %153 = sbr.rel (%p150_p9) target bundleno = 750 (0x2ee), region = 32  ;;  %p182_p10 = scmp.lt.s32.totalorder (!%p150_p9), %s516_s24, 24 }
   0xf   : > { %s526_s25 = sshll.u32 (!%p150_p9), %s732_s16, 5  ;;  %s690_s6 = smov (!%p150_p9), [#allocation2]  }
  0x10   : > { %s450_s30 = scalar_lea.hbm (!%p150_p9), %s865_s3, %s526_s25 }
  0x13   : > { %v687_v0 = vmov 0.0   ;;  %vm688_vm0 = vmmov 0   ;;  %v219_v1 = vld [vmem:[%s864_s2] sm:$0xff]  ;;  %v689_v2 = vmov 0   ;;  %v221_v3 = vld [vmem:[%s864_s2 + $0x10] sm:$0x3f] }
  0x14   : > { %542 = vmatprep.subr.bf16.mxu0 %v687_v0  ;;  %558 = vmatprep.mubr.msk.bf16.mxu0 %vm688_vm0, %v687_v0  ;;  %s873_s24 = smov (!%p182_p10, %s516_s24), 24  ;;  %v220_v4 = vld [vmem:[%s864_s2 + $0x8] sm:$0xff]  ;;  %vm237_vm1 = vcmask 162816   ;;  %v216_v37 = vld [vmem:[%s863_s1] sm:$0xf]  ;;  %vm327_vm2 = vcmask 1044480  }
  0x15   : > { %616 = vset.pattern.permute.xlu0 %v689_v2  ;;  %617 = vset.pattern.permute.xlu1 %v689_v2  ;;  %s517_s4 = sshll.u32 %s873_s24, 3  ;;  %v217_v38 = vld [vmem:[%s863_s1 + $0x4] sm:$0xf]  ;;  %v218_v46 = vld [vmem:[%s863_s1 + $0x8] sm:$0x7]  ;;  %vm323_vm3 = vcmask 80896  }
  0x16   : > { %224 = vperm.xlu0 %616, %v219_v1   ;;  %311 = vperm.xlu1 %617, %v221_v3   ;;  %s778_s7 = scalar_lea.vmem %s862_s0, %s517_s4  ;;  %v518_v39 = vcombine.low %v216_v37, %v217_v38  ;;  %v520_v51 = vcombine.low %v217_v38, %v218_v46  ;;  %vm317_vm4 = vcmask 1045504   ;;  %v522_v2 = vcombine.low %v218_v46, %v218_v46  ;;  %s515_s24 = sshll.u32 %s174_s20, 1 }
  0x17   : > { %562 = vmatprep.subr.bf16.mxu1 %v687_v0  ;;  %564 = vmatprep.mubr.msk.bf16.mxu1 %vm688_vm0, %v687_v0  ;;  %v206_v5 = vld [vmem:[%s778_s7 + $0x70] sm:$0xff]  ;;  %v207_v6 = vld [vmem:[%s778_s7 + $0x78] sm:$0xff]  ;;  %v204_v8 = vld [vmem:[%s778_s7 + $0x60] sm:$0xff]  ;;  %s176_s26 = scalar_lea.vmem [#allocation2], %s515_s24  ;;  %s439_s4 = scalar_lea.sflag [#allocation3], %s174_s20 }
  0x18   : > { %v215_v7 = vpack.c.bf16 %v207_v6, %v206_v5  ;;  %v205_v9 = vld [vmem:[%s778_s7 + $0x68] sm:$0xff]  ;;  %v202_v13 = vld [vmem:[%s778_s7 + $0x50] sm:$0xff]  ;;  %v203_v14 = vld [vmem:[%s778_s7 + $0x58] sm:$0xff]  ;;  %v316_v54 = vrot.slane %v520_v51, 1  ;;  %v376_v6 = vrot.slane %v522_v2, 2  ;;  %s452_s27 = sshll.u32 %s176_s26, 4  ;;  %s453_s27 = int_to_ptr.vmem [resolvable:$true] %s452_s27 }
  0x19   : > { %v214_v11 = vpack.c.bf16 %v205_v9, %v204_v8  ;;  %v213_v15 = vpack.c.bf16 %v203_v14, %v202_v13  ;;  %v200_v17 = vld [vmem:[%s778_s7 + $0x40] sm:$0xff]  ;;  %v201_v18 = vld [vmem:[%s778_s7 + $0x48] sm:$0xff]  ;;  %v198_v21 = vld [vmem:[%s778_s7 + $0x30] sm:$0xff]  ;;  %s625_s5 = scalar_lea.vmem %s453_s27, 32 }
  0x1a   : > { %229 = vperm.xlu0 %616, %v220_v4   ;;  %v263_v10 = vsel %vm237_vm1, %v215_v7, 0  ;;  %v212_v19 = vpack.c.bf16 %v201_v18, %v200_v17  ;;  %v199_v22 = vld [vmem:[%s778_s7 + $0x38] sm:$0xff]  ;;  %v196_v25 = vld [vmem:[%s778_s7 + $0x20] sm:$0xff]  ;;  %v197_v26 = vld [vmem:[%s778_s7 + $0x28] sm:$0xff]  ;;  %p626_p11 = scmp.ne.s32.totalorder %s453_s27, %s625_s5 }
  0x1b   : > { %543 = vmatpush3.bf16.xpose.msra.mxu0 %v263_v10  ;;  %v260_v12 = vsel %vm237_vm1, %v214_v11, 0  ;;  %v257_v16 = vsel %vm237_vm1, %v213_v15, 0  ;;  %v211_v23 = vpack.c.bf16 %v199_v22, %v198_v21  ;;  %v210_v27 = vpack.c.bf16 %v197_v26, %v196_v25  ;;  %v194_v29 = vld [vmem:[%s778_s7 + $0x10] sm:$0xff]  ;;  %v195_v30 = vld [vmem:[%s778_s7 + $0x18] sm:$0xff]  ;;  %v192_v33 = vld [vmem:[%s778_s7] sm:$0xff] }
  0x1c   : > { %544 = vmatprep.subr.bf16.mxu0 %v687_v0  ;;  %v254_v20 = vsel %vm237_vm1, %v212_v19, 0  ;;  %v209_v31 = vpack.c.bf16 %v195_v30, %v194_v29  ;;  %v193_v34 = vld [vmem:[%s778_s7 + $0x8] sm:$0xff]  ;;  %p627_p12 = pnand %p626_p11, %p749_p5  ;;  %s629_s7 = sshll.u32 %s690_s6, 4  ;;  %s630_s7 = int_to_ptr.vmem [resolvable:$false] %s629_s7 }
  0x1d   : > { %v251_v24 = vsel %vm237_vm1, %v211_v23, 0  ;;  %v248_v28 = vsel %vm237_vm1, %v210_v27, 0  ;;  %v208_v35 = vpack.c.bf16 %v193_v34, %v192_v33  ;;  %s631_s16 = scalar_lea.vmem %s630_s7, 64  ;;  %p632_p0 = scmp.lt.s32.totalorder %s453_s27, %s630_s7 }
  0x1e   : > { %v245_v32 = vsel %vm237_vm1, %v209_v31, 0  ;;  %p628_p13 = pneg %p627_p12  ;;  %p633_p1 = scmp.lt.s32.totalorder %s631_s16, %s625_s5 }
  0x1f   : > { %v242_v36 = vsel %vm237_vm1, %v208_v35, 0 }
  0x20   : > { %p634_p2 = por %p633_p1, %p632_p0 }
  0x22   : > { %p635_p3 = pnand %p634_p2, %p628_p13 }
  0x23   : > { %545 = vmatpush3.bf16.xpose.msra.mxu0 %v260_v12 }
  0x24   : > { %546 = vmatprep.subr.bf16.mxu0 %v687_v0 }
  0x2b   : > { %547 = vmatpush3.bf16.xpose.msra.mxu0 %v257_v16 }
  0x2c   : > { %548 = vmatprep.subr.bf16.mxu0 %v687_v0 }
  0x33   : > { %549 = vmatpush3.bf16.xpose.msra.mxu0 %v254_v20 }
  0x34   : > { %550 = vmatprep.subr.bf16.mxu0 %v687_v0 }
  0x3b   : > { %551 = vmatpush3.bf16.xpose.msra.mxu0 %v251_v24 }
  0x3c   : > { %552 = vmatprep.subr.bf16.mxu0 %v687_v0 }
  0x43   : > { %553 = vmatpush3.bf16.xpose.msra.mxu0 %v248_v28 }
  0x44   : > { %554 = vmatprep.subr.bf16.mxu0 %v687_v0 }
  0x4b   : > { %555 = vmatpush3.bf16.xpose.msra.mxu0 %v245_v32 }
  0x4c   : > { %556 = vmatprep.subr.bf16.mxu0 %v687_v0 }
  0x53   : > { %557 = vmatpush3.bf16.xpose.msra.mxu0 %v242_v36 }
  0x5a   : > { %559 = vmatmul.mubr.msk.bf16.vlgmr.msra.gmra.mxu0 %vm237_vm1, %v518_v39 }
  0x91   : > { %v225_v40 = vpop.permute.xlu0 %224  ;;  %v312_v55 = vpop.permute.xlu1 %311 }
  0x92   : > { %v319_v56 = vrot.slane %v312_v55, 2 }
  0x95   : > { %v230_v44 = vpop.permute.xlu0 %229 }
  0x96   : > { %v318_v57 = vrot.slane %v230_v44, 2 }
  0x98   : > { %v320_v59 = vsel %vm317_vm4, %v318_v57, %v319_v56 }
 0x11a   : > { %v299_v41 = vpop.f32.mrf.mxu0 }
 0x11b   : > { %v300_v43 = vadd.f32 %v299_v41, %v225_v40 }
 0x11c   : > { %v560_v42 = vpop.f32.mrf.mxu0 }
 0x11d   : > { %v306_v49 = vmax.f32 %v300_v43, 0.0 }
 0x11e   : > { %v302_v45 = vpop.f32.mrf.mxu0 }
 0x11f   : > { %v303_v47 = vadd.f32 %v302_v45, %v230_v44 }
 0x120   : > { %v561_v48 = vpop.f32.mrf.mxu0 }
 0x121   : > { %v307_v50 = vmax.f32 %v303_v47, 0.0 }
 0x123   : > { %v308_v52 = vpack.c.bf16 %v307_v50, %v306_v49 }
 0x125   : > { %v329_v53 = vsel %vm327_vm2, %v308_v52, 0 }
 0x126   : > { %563 = vmatpush3.bf16.msra.mxu1 %v329_v53 }
 0x127   : > { %568 = vmatprep.subr.bf16.mxu1 %v687_v0 }
 0x129   : > { %565 = vmatmul.mubr.msk.bf16.vlgmr.msra.gmra.mxu1 %vm323_vm3, %v316_v54 }
 0x12a   : > { %570 = vmatprep.mubr.msk.bf16.mxu1 %vm688_vm0, %v687_v0  ;;  %v377_v0 = vrot.slane %v312_v55, 4 }
 0x1e9   : > { %v365_v58 = vpop.f32.mrf.mxu1 }
 0x1ea   : > { %v366_v61 = vadd.f32 %v365_v58, %v320_v59 }
 0x1eb   : > { %v566_v60 = vpop.f32.mrf.mxu1 }
 0x1ec   : > { %v372_v3 = vmax.f32 %v366_v61, 0.0 }
 0x1ed   : > { %v368_v62 = vpop.f32.mrf.mxu1 }
 0x1ee   : > { %v369_v63 = vadd.f32 %v368_v62, %v319_v56 }
 0x1ef   : > { %v567_v1 = vpop.f32.mrf.mxu1 }
 0x1f0   : > { %v373_v4 = vmax.f32 %v369_v63, 0.0 }
 0x1f2   : > { %v374_v5 = vpack.c.bf16 %v373_v4, %v372_v3 }
 0x1f4   : > { %v383_v7 = vsel %vm327_vm2, %v374_v5, 0 }
 0x1f5   : > { %569 = vmatpush3.bf16.msra.mxu1 %v383_v7 }
 0x1f8   : > { %571 = vmatmul.mubr.msk.bf16.vlgmr.msra.gmra.mxu1 %vm323_vm3, %v376_v6 }
 0x2b8   : > { %v419_v8 = vpop.f32.mrf.mxu1 }
 0x2b9   : > { %v420_v9 = vadd.f32 %v419_v8, %v377_v0 }
 0x2ba   : > { %v572_v10 = vpop.f32.mrf.mxu1 }
 0x2bb   : > { %v426_v11 = vrot.slane %v420_v9, 1 }
 0x2bc   : > { %v422_v12 = vpop.f32.mrf.mxu1 }
 0x2bd   : > { %v428_v13 = vsub.f32 %v420_v9, %v426_v11 }
 0x2be   : > { %v573_v14 = vpop.f32.mrf.mxu1 }
 0x2bf   : > { %v524_v15 = vmul.f32 -1.442695, %v428_v13 }
 0x2c1   : > { %621 = vpow2.f32 %v524_v15 }
 0x2ce   : > { %v622_v16 = vpop.eup %621 }
 0x2cf   : > { %v432_v17 = vadd.f32 1.0, %v622_v16 }
 0x2d1   : > { %623 = vrcp.f32 %v432_v17 }
 0x2de   : > { %v624_v18 = vpop.eup %623 }
 0x2df   : > { %435 = vst [vmem:[%s176_s26] sm:$0x1] %v624_v18  ;;  %v436_v19 = vsub.f32 1.0, %v624_v18 }
 0x2e1   : > { %437 = vst [vmem:[%s176_s26 + $0x1] sm:$0x1] %v436_v19 }
 0x2e2   : > { %638 = shalt.err (!%p635_p3)
}
 0x2e3   : > { %s639_s8 = scalar_lea.hbm %s450_s30, 32  ;;  %s643_s11 = scalar_lea.hbm %s865_s3, 64 }
 0x2e4   : > { %p640_p4 = scmp.ne.s32.totalorder %s450_s30, %s639_s8  ;;  %p644_p9 = scmp.lt.s32.totalorder %s450_s30, %s865_s3 }
 0x2e5   : > { %p645_p10 = scmp.lt.s32.totalorder %s643_s11, %s639_s8 }
 0x2e6   : > { %p641_p7 = pnand %p640_p4, %p749_p5 }
 0x2e7   : > { %p646_p11 = por %p645_p10, %p644_p9 }
 0x2e8   : > { %p642_p8 = pneg %p641_p7 }
 0x2ea   : > { %p647_p12 = pnand %p646_p11, %p642_p8 }
 0x2ec   : > { %650 = shalt.err (!%p647_p12)
}
 0x2ed   : > { %574 = dma.vmem_to_hbm [thread:$0]  (%p749_p5), %s453_s27, 32, %s450_s30, %s439_s4  }
 0x2ee PF: > { %p580_p13 = scmp.ge.s32.totalorder %s685_s15, 2  ;;  %s464_s20 = sand.u32 1, %s673_s12  }
 0x2ef   : > { %s465_s24 = scalar_lea.sflag [#allocation3], %s464_s20 }
 0x2f0   : > { %p577_p0 = pnand %p580_p13, %p753_p6 }
 0x2f2   : > { %p578_p1 = pneg %p577_p0 }
 0x2f4   : > { %668 = dma.done.wait (%p578_p1), %s465_s24, 32  }
 0x2f5   : > { %670 = vsyncadd (%p578_p1), %s465_s24, 4294967264  ;;  %p13_p2 = scmp.ge.s32.totalorder %s736_s18, 4   ;;  %s868_s12 = smov %s677_s13 }
 0x2f6   : > { %s869_s13 = smov %s681_s14  ;;  %s870_s14 = smov %s747_s21 }
 0x2f7   : > { %s871_s15 = smov %s736_s18  ;;  %15 = sbr.rel (!%p13_p2) target bundleno = 3 (0x3), region = 67 }
 0x2fc   :  { %470 = vsyncpa [#allocation3], 1 }
 0x2fd   :  { %472 = vsyncpa [#allocation3 + $0x1], 1 }

</bundles_post_ra>
